<compile_context>
chip_gen: v7x
topology: tpu7x:2x2x1
jax: 0.10.0
libtpu: 0.0.40
codegen_flags: <defaults>
</compile_context>

<pallas_src>
import functools

import jax
import jax.numpy as jnp
from jax.experimental import pallas as pl
from jax.experimental.pallas import tpu as pltpu  # noqa: F401  (TPU backend)

EPS = 1e-5
NEG_SLOPE = 0.01
LANE = 128


def _round_up(v, m):
    return ((v + m - 1) // m) * m


def _pad2(a, rows, cols):
    return jnp.pad(a, ((0, rows - a.shape[0]), (0, cols - a.shape[1])))


def _bn_scale_shift(x, gamma, beta):
    """Training-mode BatchNorm folded into one scale/shift FMA (biased variance)."""
    mean = jnp.mean(x, axis=0, keepdims=True)
    var = jnp.mean((x - mean) ** 2, axis=0, keepdims=True)
    scale = jax.lax.rsqrt(var + EPS) * gamma
    shift = beta - mean * scale
    return x * scale + shift


def _leaky_relu(x):
    # mul + max (one fewer VALU op than compare + select)
    return jnp.maximum(x, NEG_SLOPE * x)


def mlp_block_kernel(x_ref, bn1_ref, w1_ref, bn2_ref, w2_ref, o_ref):
    x = x_ref[...]                                   # (N, IN_P) f32

    # --- bn1 + LeakyReLU ---------------------------------------------------
    g1 = bn1_ref[0:1, :]
    b1 = bn1_ref[1:2, :]
    h = _leaky_relu(_bn_scale_shift(x, g1, b1))

    # --- fc1 (bf16 MXU, f32 accumulate).  fc1 bias omitted: it cancels exactly
    #     under the batch-statistic bn2 that follows. ------------------------
    y = jnp.dot(h.astype(jnp.bfloat16), w1_ref[...],
                preferred_element_type=jnp.float32)  # (N, OUT_P) f32

    # --- bn2 + LeakyReLU ---------------------------------------------------
    g2 = bn2_ref[0:1, :]
    b2 = bn2_ref[1:2, :]
    fb2 = bn2_ref[2:3, :]
    z = _leaky_relu(_bn_scale_shift(y, g2, b2))

    # --- fc2 ---------------------------------------------------------------
    out = jnp.dot(z.astype(jnp.bfloat16), w2_ref[...],
                  preferred_element_type=jnp.float32) + fb2

    o_ref[...] = out.astype(o_ref.dtype)


@jax.jit
def mlp_block(x, g1, b1, w1_t, fb1, g2, b2, w2_t, fb2):
    """x: (N, in_dim); w1_t: (in_dim, out_dim); w2_t: (out_dim, out_dim);
    BN params gk/bk and fc biases fbk are (1, F) rows."""
    n, in_dim = x.shape
    out_dim = w1_t.shape[1]
    in_p = _round_up(in_dim, LANE)
    out_p = _round_up(out_dim, LANE)

    # Lane-dense, zero-padded operands.  Batch dim is NOT padded (BN statistics).
    x_p = _pad2(x, n, in_p)
    bn1 = _pad2(jnp.concatenate([g1, b1], axis=0), 2, in_p)          # (2, IN_P)
    bn2 = _pad2(jnp.concatenate([g2, b2, fb2], axis=0), 3, out_p)    # (3, OUT_P)
    w1_p = _pad2(w1_t, in_p, out_p).astype(jnp.bfloat16)             # (IN_P, OUT_P)
    w2_p = _pad2(w2_t, out_p, out_p).astype(jnp.bfloat16)            # (OUT_P, OUT_P)
    del fb1  # per-feature constant before batch-stat BN2 cancels exactly

    args = (x_p, bn1, w1_p, bn2, w2_p)
    full = lambda a: pl.BlockSpec(a.shape, lambda: (0,) * a.ndim)

    out_pad = pl.pallas_call(
        mlp_block_kernel,
        out_shape=jax.ShapeDtypeStruct((n, out_p), jnp.float32),
        grid=(),
        in_specs=[full(a) for a in args],
        out_specs=pl.BlockSpec((n, out_p), lambda: (0, 0)),
    )(*args)

    return out_pad[:, :out_dim]


def mlp_block_reference(x, g1, b1, w1_t, fb1, g2, b2, w2_t, fb2):
    """Pure-JAX f32 reference matching the PyTorch training-mode forward."""
    def bn(h, g, bb):
        m = jnp.mean(h, axis=0, keepdims=True)
        v = jnp.mean((h - m) ** 2, axis=0, keepdims=True)
        return (h - m) * jax.lax.rsqrt(v + EPS) * g + bb

    def lrelu(h):
        return jnp.where(h > 0, h, NEG_SLOPE * h)

    h = lrelu(bn(x, g1, b1))
    y = h @ w1_t + fb1
    z = lrelu(bn(y, g2, b2))
    return z @ w2_t + fb2


def init_params(key, in_dim, out_dim):
    """Deterministic parameter init matching MlpBlock.__init__ (weights stored
    pre-transposed as (in, out))."""
    k1, k2, k3, k4 = jax.random.split(key, 4)

    # BatchNorm1d defaults: weight=1, bias=0
    g1 = jnp.ones((1, in_dim), jnp.float32)
    b1 = jnp.zeros((1, in_dim), jnp.float32)
    g2 = jnp.ones((1, out_dim), jnp.float32)
    b2 = jnp.zeros((1, out_dim), jnp.float32)

    # fc1: kaiming_uniform_ -> bound = sqrt(6 / fan_in)
    bound1 = (6.0 / in_dim) ** 0.5
    w1 = jax.random.uniform(k1, (out_dim, in_dim), jnp.float32, -bound1, bound1)
    bbound1 = 1.0 / (in_dim ** 0.5)
    fb1 = jax.random.uniform(k2, (1, out_dim), jnp.float32, -bbound1, bbound1)

    # fc2
    bound2 = (6.0 / out_dim) ** 0.5
    w2 = jax.random.uniform(k3, (out_dim, out_dim), jnp.float32, -bound2, bound2)
    bbound2 = 1.0 / (out_dim ** 0.5)
    fb2 = jax.random.uniform(k4, (1, out_dim), jnp.float32, -bbound2, bbound2)

    return g1, b1, w1.T, fb1, g2, b2, w2.T, fb2


if __name__ == "__main__":
    IN_DIM, OUT_DIM, BATCH = 32, 16, 8

    key = jax.random.PRNGKey(0)
    kx, kp = jax.random.split(key)
    x = jax.random.normal(kx, (BATCH, IN_DIM), jnp.float32)

    params = init_params(kp, IN_DIM, OUT_DIM)

    out = mlp_block(x, *params)
    jax.block_until_ready(out)

    # correctness vs pure-JAX f32 reference (loose tolerance: bf16 MXU operands)
    ref = mlp_block_reference(x, *params)
    assert out.shape == (BATCH, OUT_DIM), out.shape
    assert bool(jnp.all(jnp.isfinite(out)))
    max_err = float(jnp.max(jnp.abs(out - ref)))
    assert max_err < 1e-1, f"max_err={max_err}"

    print("KERNEL_OK")
</pallas_src>

<mosaic_0001>
module attributes {stable_mosaic.version = 11 : i64} {
  func.func @mlp_block_kernel(%arg0: memref<8x128xf32, #tpu.memory_space<vmem>>, %arg1: memref<2x128xf32, #tpu.memory_space<vmem>>, %arg2: memref<128x128xbf16, #tpu.memory_space<vmem>>, %arg3: memref<3x128xf32, #tpu.memory_space<vmem>>, %arg4: memref<128x128xbf16, #tpu.memory_space<vmem>>, %arg5: memref<8x128xf32, #tpu.memory_space<vmem>>) attributes {dimension_semantics = [], scalar_prefetch = 0 : i64, scratch_operands = 0 : i64, tpu.core_type = #tpu.core_type<tc>} {
    %c0 = arith.constant 0 : index
    %c0_0 = arith.constant 0 : index
    %0 = vector.load %arg0[%c0, %c0_0] : memref<8x128xf32, #tpu.memory_space<vmem>>, vector<8x128xf32>
    %c0_1 = arith.constant 0 : index
    %c0_2 = arith.constant 0 : index
    %1 = vector.load %arg1[%c0_1, %c0_2] : memref<2x128xf32, #tpu.memory_space<vmem>>, vector<1x128xf32>
    %c1 = arith.constant 1 : index
    %c0_3 = arith.constant 0 : index
    %2 = vector.load %arg1[%c1, %c0_3] : memref<2x128xf32, #tpu.memory_space<vmem>>, vector<1x128xf32>
    %cst = arith.constant dense<0.000000e+00> : vector<128xf32>
    %3 = vector.multi_reduction <add>, %0, %cst [0] : vector<8x128xf32> to vector<128xf32>
    %4 = vector.shape_cast %3 : vector<128xf32> to vector<1x128xf32>
    %cst_4 = arith.constant 8.000000e+00 : f32
    %5 = vector.broadcast %cst_4 : f32 to vector<1x128xf32>
    %6 = arith.divf %4, %5 : vector<1x128xf32>
    %7 = vector.broadcast %6 : vector<1x128xf32> to vector<8x128xf32>
    %8 = arith.subf %0, %7 : vector<8x128xf32>
    %9 = arith.mulf %8, %8 : vector<8x128xf32>
    %cst_5 = arith.constant dense<0.000000e+00> : vector<128xf32>
    %10 = vector.multi_reduction <add>, %9, %cst_5 [0] : vector<8x128xf32> to vector<128xf32>
    %11 = vector.shape_cast %10 : vector<128xf32> to vector<1x128xf32>
    %cst_6 = arith.constant 8.000000e+00 : f32
    %12 = vector.broadcast %cst_6 : f32 to vector<1x128xf32>
    %13 = arith.divf %11, %12 : vector<1x128xf32>
    %cst_7 = arith.constant 9.99999974E-6 : f32
    %14 = vector.broadcast %cst_7 : f32 to vector<1x128xf32>
    %15 = arith.addf %13, %14 : vector<1x128xf32>
    %16 = math.rsqrt %15 : vector<1x128xf32>
    %17 = arith.mulf %16, %1 : vector<1x128xf32>
    %18 = arith.mulf %6, %17 : vector<1x128xf32>
    %19 = arith.subf %2, %18 : vector<1x128xf32>
    %20 = vector.broadcast %17 : vector<1x128xf32> to vector<8x128xf32>
    %21 = arith.mulf %0, %20 : vector<8x128xf32>
    %22 = vector.broadcast %19 : vector<1x128xf32> to vector<8x128xf32>
    %23 = arith.addf %21, %22 : vector<8x128xf32>
    %cst_8 = arith.constant 0.00999999977 : f32
    %24 = vector.broadcast %cst_8 : f32 to vector<8x128xf32>
    %25 = arith.mulf %24, %23 : vector<8x128xf32>
    %26 = arith.maximumf %23, %25 : vector<8x128xf32>
    %27 = arith.truncf %26 : vector<8x128xf32> to vector<8x128xbf16>
    %c0_9 = arith.constant 0 : index
    %c0_10 = arith.constant 0 : index
    %28 = vector.load %arg2[%c0_9, %c0_10] : memref<128x128xbf16, #tpu.memory_space<vmem>>, vector<128x128xbf16>
    %cst_11 = arith.constant dense<0.000000e+00> : vector<8x128xf32>
    %29 = tpu.matmul %27, %28, %cst_11 {dimension_numbers = #tpu.dot_dimension_numbers<[1], [0], [0], [1], [0, 0, 1, 1], [], []>} : vector<8x128xbf16>, vector<128x128xbf16>, vector<8x128xf32> -> vector<8x128xf32>
    %c0_12 = arith.constant 0 : index
    %c0_13 = arith.constant 0 : index
    %30 = vector.load %arg3[%c0_12, %c0_13] : memref<3x128xf32, #tpu.memory_space<vmem>>, vector<1x128xf32>
    %c1_14 = arith.constant 1 : index
    %c0_15 = arith.constant 0 : index
    %31 = vector.load %arg3[%c1_14, %c0_15] : memref<3x128xf32, #tpu.memory_space<vmem>>, vector<1x128xf32>
    %c2 = arith.constant 2 : index
    %c0_16 = arith.constant 0 : index
    %32 = vector.load %arg3[%c2, %c0_16] : memref<3x128xf32, #tpu.memory_space<vmem>>, vector<1x128xf32>
    %cst_17 = arith.constant dense<0.000000e+00> : vector<128xf32>
    %33 = vector.multi_reduction <add>, %29, %cst_17 [0] : vector<8x128xf32> to vector<128xf32>
    %34 = vector.shape_cast %33 : vector<128xf32> to vector<1x128xf32>
    %cst_18 = arith.constant 8.000000e+00 : f32
    %35 = vector.broadcast %cst_18 : f32 to vector<1x128xf32>
    %36 = arith.divf %34, %35 : vector<1x128xf32>
    %37 = vector.broadcast %36 : vector<1x128xf32> to vector<8x128xf32>
    %38 = arith.subf %29, %37 : vector<8x128xf32>
    %39 = arith.mulf %38, %38 : vector<8x128xf32>
    %cst_19 = arith.constant dense<0.000000e+00> : vector<128xf32>
    %40 = vector.multi_reduction <add>, %39, %cst_19 [0] : vector<8x128xf32> to vector<128xf32>
    %41 = vector.shape_cast %40 : vector<128xf32> to vector<1x128xf32>
    %cst_20 = arith.constant 8.000000e+00 : f32
    %42 = vector.broadcast %cst_20 : f32 to vector<1x128xf32>
    %43 = arith.divf %41, %42 : vector<1x128xf32>
    %cst_21 = arith.constant 9.99999974E-6 : f32
    %44 = vector.broadcast %cst_21 : f32 to vector<1x128xf32>
    %45 = arith.addf %43, %44 : vector<1x128xf32>
    %46 = math.rsqrt %45 : vector<1x128xf32>
    %47 = arith.mulf %46, %30 : vector<1x128xf32>
    %48 = arith.mulf %36, %47 : vector<1x128xf32>
    %49 = arith.subf %31, %48 : vector<1x128xf32>
    %50 = vector.broadcast %47 : vector<1x128xf32> to vector<8x128xf32>
    %51 = arith.mulf %29, %50 : vector<8x128xf32>
    %52 = vector.broadcast %49 : vector<1x128xf32> to vector<8x128xf32>
    %53 = arith.addf %51, %52 : vector<8x128xf32>
    %cst_22 = arith.constant 0.00999999977 : f32
    %54 = vector.broadcast %cst_22 : f32 to vector<8x128xf32>
    %55 = arith.mulf %54, %53 : vector<8x128xf32>
    %56 = arith.maximumf %53, %55 : vector<8x128xf32>
    %57 = arith.truncf %56 : vector<8x128xf32> to vector<8x128xbf16>
    %c0_23 = arith.constant 0 : index
    %c0_24 = arith.constant 0 : index
    %58 = vector.load %arg4[%c0_23, %c0_24] : memref<128x128xbf16, #tpu.memory_space<vmem>>, vector<128x128xbf16>
    %cst_25 = arith.constant dense<0.000000e+00> : vector<8x128xf32>
    %59 = tpu.matmul %57, %58, %cst_25 {dimension_numbers = #tpu.dot_dimension_numbers<[1], [0], [0], [1], [0, 0, 1, 1], [], []>} : vector<8x128xbf16>, vector<128x128xbf16>, vector<8x128xf32> -> vector<8x128xf32>
    %60 = vector.broadcast %32 : vector<1x128xf32> to vector<8x128xf32>
    %61 = arith.addf %59, %60 : vector<8x128xf32>
    %c0_26 = arith.constant 0 : index
    %c0_27 = arith.constant 0 : index
    %62 = vector.load %arg5[%c0_26, %c0_27] : memref<8x128xf32, #tpu.memory_space<vmem>>, vector<8x128xf32>
    tpu.vector_store %arg5[%c0_26, %c0_27], %61 {strides = array<i32>} : memref<8x128xf32, #tpu.memory_space<vmem>>, vector<8x128xf32>,
    return
  }
}

</mosaic_0001>

<bundles_post_ra>
// kernel: mlp_block.1
= control target key start
LH: loop header
LB: loop body
LE: loop exit
PB: predicated region body
PF: predicated region fallthrough
CT: control target
= control target key end

     0   :  { %v446_v1 = vmov 0.0   ;;  %vm447_vm0 = vmmov 0   ;;  %s581_s0 = inlined_call_operand.vmem [shape: f32[8,128], index: 0, kind: input, shape index: {}]   ;;  %s582_s1 = inlined_call_operand.vmem [shape: f32[2,128], index: 1, kind: input, shape index: {}]   ;;  %s583_s2 = inlined_call_operand.vmem [shape: bf16[128,128], index: 2, kind: input, shape index: {}]   ;;  %s584_s3 = inlined_call_operand.vmem [shape: f32[3,128], index: 3, kind: input, shape index: {}]   ;;  %s585_s4 = inlined_call_operand.vmem [shape: bf16[128,128], index: 4, kind: input, shape index: {}]   ;;  %s586_s5 = inlined_call_operand.hbm [shape: f32[8,128], index: 5, kind: output, shape index: {}]  }
   0x1   :  { %v402_v0 = vld [vmem:[%s583_s2] sm:$0xff]   ;;  %359 = vmatprep.subr.bf16.mxu0 %v446_v1  ;;  %379 = vmatprep.subr.bf16.mxu1 %v446_v1  ;;  %v403_v2 = vld [vmem:[%s583_s2 + $0x8] sm:$0xff]   ;;  %v404_v3 = vld [vmem:[%s583_s2 + $0x10] sm:$0xff]  }
   0x2   :  { %360 = vmatpush3.bf16.msra.mxu0 %v402_v0  ;;  %375 = vmatprep.mubr.msk.bf16.mxu0 %vm447_vm0, %v446_v1  ;;  %v22_v4 = vld [vmem:[%s581_s0] sm:$0xff]  ;;  %v405_v5 = vld [vmem:[%s583_s2 + $0x18] sm:$0xff]  }
   0x3   :  { %361 = vmatprep.subr.bf16.mxu0 %v446_v1  ;;  %395 = vmatprep.mubr.msk.bf16.mxu1 %vm447_vm0, %v446_v1  ;;  %v25_v6 = vrot.slane %v22_v4, 4  ;;  %v406_v8 = vld [vmem:[%s583_s2 + $0x20] sm:$0xff]  }
   0x5   :  { %v26_v7 = vadd.f32 %v25_v6, %v22_v4 }
   0x6   :  { %362 = vmatpush3.bf16.msra.mxu0 %v403_v2 }
   0x7   :  { %363 = vmatprep.subr.bf16.mxu0 %v446_v1  ;;  %v27_v9 = vrot.slane %v26_v7, 2 }
   0x9   :  { %v28_v10 = vadd.f32 %v27_v9, %v26_v7 }
   0xa   :  { %364 = vmatpush3.bf16.msra.mxu0 %v404_v3 }
   0xb   :  { %365 = vmatprep.subr.bf16.mxu0 %v446_v1 }
   0xe   :  { %366 = vmatpush3.bf16.msra.mxu0 %v405_v5 }
   0xf   :  { %367 = vmatprep.subr.bf16.mxu0 %v446_v1 }
  0x10   :  { %10 = vsyncpa [#allocation3], 0  ;;  %v29_v11 = vrot.slane %v28_v10, 1  ;;  %v407_v12 = vld [vmem:[%s583_s2 + $0x28] sm:$0xff]   ;;  %v408_v15 = vld [vmem:[%s583_s2 + $0x30] sm:$0xff]   ;;  %v47_v27 = vlaneseq  ;;  %s448_s7 = smov [#allocation2]  }
  0x11   :  { %v409_v18 = vld [vmem:[%s583_s2 + $0x38] sm:$0xff]   ;;  %v23_v29 = vld [vmem:[%s582_s1] sm:$0x1]  ;;  %v24_v33 = vld [vmem:[%s582_s1 + $0x1] sm:$0x1]  ;;  %s316_s8 = sshll.u32 %s448_s7, 4  ;;  %s317_s8 = int_to_ptr.vmem [resolvable:$true] %s316_s8 }
  0x12   :  { %368 = vmatpush3.bf16.msra.mxu0 %v406_v8  ;;  %v30_v13 = vadd.f32 %v29_v11, %v28_v10  ;;  %v48_v28 = vshrl.u32 %v47_v27, 7  ;;  %v410_v43 = vld [vmem:[%s585_s4] sm:$0xff]   ;;  %v411_v44 = vld [vmem:[%s585_s4 + $0x8] sm:$0xff]   ;;  %v412_v45 = vld [vmem:[%s585_s4 + $0x10] sm:$0xff]   ;;  %s422_s9 = scalar_lea.vmem %s317_s8, 128  ;;  %p427_p1 = scmp.lt.s32.totalorder %s317_s8, %s317_s8 }
  0x13   :  { %369 = vmatprep.subr.bf16.mxu0 %v446_v1  ;;  %380 = vmatpush3.bf16.msra.mxu1 %v410_v43  ;;  %v413_v46 = vld [vmem:[%s585_s4 + $0x18] sm:$0xff]   ;;  %v414_v47 = vld [vmem:[%s585_s4 + $0x20] sm:$0xff]   ;;  %v415_v48 = vld [vmem:[%s585_s4 + $0x28] sm:$0xff]   ;;  %p423_p0 = scmp.ne.s32.totalorder %s317_s8, %s422_s9  ;;  %p428_p2 = scmp.lt.s32.totalorder %s422_s9, %s422_s9 }
  0x14   :  { %v32_v14 = vmul.f32 0.125, %v30_v13  ;;  %v520_v30 = vsub.s32 0, %v48_v28  ;;  %381 = vmatprep.subr.bf16.mxu1 %v446_v1  ;;  %v416_v49 = vld [vmem:[%s585_s4 + $0x30] sm:$0xff]   ;;  %v417_v50 = vld [vmem:[%s585_s4 + $0x38] sm:$0xff]   ;;  %v164_v8 = vld [vmem:[%s584_s3] sm:$0x1] }
  0x15   :  { %v165_v11 = vld [vmem:[%s584_s3 + $0x1] sm:$0x1]  ;;  %p429_p3 = por %p428_p2, %p427_p1 }
  0x16   :  { %370 = vmatpush3.bf16.msra.mxu0 %v407_v12  ;;  %v33_v16 = vsub.f32 %v22_v4, %v32_v14 }
  0x17   :  { %371 = vmatprep.subr.bf16.mxu0 %v446_v1  ;;  %382 = vmatpush3.bf16.msra.mxu1 %v411_v44  ;;  %p430_p4 = pnand %p429_p3, %p423_p0 }
  0x18   :  { %v34_v17 = vmul.f32 %v33_v16, %v33_v16  ;;  %383 = vmatprep.subr.bf16.mxu1 %v446_v1 }
  0x1a   :  { %372 = vmatpush3.bf16.msra.mxu0 %v408_v15  ;;  %v35_v19 = vrot.slane %v34_v17, 4 }
  0x1b   :  { %373 = vmatprep.subr.bf16.mxu0 %v446_v1  ;;  %384 = vmatpush3.bf16.msra.mxu1 %v412_v45 }
  0x1c   :  { %v36_v20 = vadd.f32 %v35_v19, %v34_v17  ;;  %385 = vmatprep.subr.bf16.mxu1 %v446_v1 }
  0x1e   :  { %374 = vmatpush3.bf16.msra.mxu0 %v409_v18  ;;  %v37_v21 = vrot.slane %v36_v20, 2 }
  0x1f   :  { %386 = vmatpush3.bf16.msra.mxu1 %v413_v46 }
  0x20   :  { %v38_v22 = vadd.f32 %v37_v21, %v36_v20  ;;  %387 = vmatprep.subr.bf16.mxu1 %v446_v1  ;;  %v332_v21 = vld [vmem:[%s584_s3 + $0x2] ss:$0 sm:$0xff] }
  0x22   :  { %v39_v23 = vrot.slane %v38_v22, 1 }
  0x23   :  { %388 = vmatpush3.bf16.msra.mxu1 %v414_v47 }
  0x24   :  { %v40_v24 = vadd.f32 %v39_v23, %v38_v22  ;;  %389 = vmatprep.subr.bf16.mxu1 %v446_v1 }
  0x26   :  { %v41_v25 = vmul.f32 0.125, %v40_v24 }
  0x27   :  { %390 = vmatpush3.bf16.msra.mxu1 %v415_v48 }
  0x28   :  { %v42_v26 = vadd.f32 1e-05, %v41_v25  ;;  %391 = vmatprep.subr.bf16.mxu1 %v446_v1 }
  0x2a   :  { %418 = vrsqrt.f32 %v42_v26 }
  0x2b   :  { %392 = vmatpush3.bf16.msra.mxu1 %v416_v49 }
  0x2c   :  { %393 = vmatprep.subr.bf16.mxu1 %v446_v1 }
  0x2f   :  { %394 = vmatpush3.bf16.msra.mxu1 %v417_v50 }
  0x34   :  { %v419_v31 = vpop.eup %418 }
  0x35   :  { %v44_v32 = vmul.f32 %v419_v31, %v23_v29 }
  0x37   :  { %v45_v34 = vmul.f32 %v44_v32, %v32_v14  ;;  %v50_v35 = vrot.slane %v44_v32, %v520_v30 }
  0x39   :  { %v46_v36 = vsub.f32 %v24_v33, %v45_v34  ;;  %v51_v37 = vmul.f32 %v50_v35, %v22_v4 }
  0x3b   :  { %v55_v38 = vrot.slane %v46_v36, %v520_v30 }
  0x3d   :  { %v56_v39 = vadd.f32 %v55_v38, %v51_v37 }
  0x3f   :  { %v57_v40 = vmul.f32 0.01, %v56_v39 }
  0x41   :  { %v58_v41 = vmax.f32 %v56_v39, %v57_v40 }
  0x43   :  { %v59_v42 = vpack.c.bf16 %v58_v41, %v58_v41 }
  0x45   :  { %376 = vmatmul.mubr.bf16.vlgmr.msra.gmra.mrb[0].mxu0 %v59_v42 }
 0x118   :  { %v158_v51 = vpop.f32.mrb[0].mxu0 }
 0x119   :  { %v167_v52 = vrot.slane %v158_v51, 4  ;;  %v377_v53 = vpop.f32.mrb[1].mxu0 }
 0x11a   :  { %v161_v54 = vpop.f32.mrb[2].mxu0 }
 0x11b   :  { %v168_v55 = vadd.f32 %v167_v52, %v158_v51  ;;  %v378_v56 = vpop.f32.mrb[3].mxu0 }
 0x11d   :  { %v169_v57 = vrot.slane %v168_v55, 2 }
 0x11f   :  { %v170_v58 = vadd.f32 %v169_v57, %v168_v55 }
 0x121   :  { %v171_v59 = vrot.slane %v170_v58, 1 }
 0x123   :  { %v172_v60 = vadd.f32 %v171_v59, %v170_v58 }
 0x125   :  { %v173_v61 = vmul.f32 0.125, %v172_v60 }
 0x127   :  { %v174_v62 = vsub.f32 %v158_v51, %v173_v61 }
 0x129   :  { %v175_v63 = vmul.f32 %v174_v62, %v174_v62 }
 0x12b   :  { %v176_v0 = vrot.slane %v175_v63, 4 }
 0x12d   :  { %v177_v2 = vadd.f32 %v176_v0, %v175_v63 }
 0x12f   :  { %v178_v3 = vrot.slane %v177_v2, 2 }
 0x131   :  { %v179_v4 = vadd.f32 %v178_v3, %v177_v2 }
 0x133   :  { %v180_v5 = vrot.slane %v179_v4, 1 }
 0x135   :  { %v181_v1 = vadd.f32 %v180_v5, %v179_v4 }
 0x137   :  { %v182_v6 = vmul.f32 0.125, %v181_v1 }
 0x139   :  { %v183_v7 = vadd.f32 1e-05, %v182_v6 }
 0x13b   :  { %420 = vrsqrt.f32 %v183_v7 }
 0x145   :  { %v421_v9 = vpop.eup %420 }
 0x146   :  { %v185_v10 = vmul.f32 %v421_v9, %v164_v8 }
 0x148   :  { %v186_v12 = vmul.f32 %v185_v10, %v173_v61  ;;  %v191_v13 = vrot.slane %v185_v10, %v520_v30 }
 0x14a   :  { %v187_v14 = vsub.f32 %v165_v11, %v186_v12  ;;  %v192_v15 = vmul.f32 %v191_v13, %v158_v51 }
 0x14c   :  { %v196_v16 = vrot.slane %v187_v14, %v520_v30 }
 0x14e   :  { %v197_v17 = vadd.f32 %v196_v16, %v192_v15 }
 0x150   :  { %v198_v18 = vmul.f32 0.01, %v197_v17 }
 0x152   :  { %v199_v19 = vmax.f32 %v197_v17, %v198_v18 }
 0x154   :  { %v200_v20 = vpack.c.bf16 %v199_v19, %v199_v19 }
 0x156   :  { %396 = vmatmul.mubr.bf16.vlgmr.msra.gmra.mrb[0].mxu1 %v200_v20 }
 0x229   :  { %v303_v22 = vpop.f32.mrb[0].mxu1 }
 0x22a   :  { %v304_v23 = vadd.f32 %v332_v21, %v303_v22  ;;  %v397_v24 = vpop.f32.mrb[1].mxu1 }
 0x22b   :  { %v306_v25 = vpop.f32.mrb[2].mxu1 }
 0x22c   :  { %309 = vst [vmem:[#allocation2] sm:$0xff] %v304_v23  ;;  %v398_v26 = vpop.f32.mrb[3].mxu1 }
 0x22d   :  { %433 = shalt.err (!%p430_p4)
}
 0x22e   :  { %s434_s3 = scalar_lea.hbm %s586_s5, 128 }
 0x22f   :  { %p435_p5 = scmp.ne.s32.totalorder %s586_s5, %s434_s3  ;;  %p438_p6 = scmp.lt.u32.totalorder %s434_s3, %s586_s5 }
 0x231   :  { %p440_p7 = pnand %p438_p6, %p435_p5 }
 0x233   :  { %443 = shalt.err (!%p440_p7)
}
 0x234   :  { %319 = dma.vmem_to_hbm [thread:$0]  %s317_s8, 128, %s586_s5, [#allocation3]  }
 0x235   :  { %444 = dma.done.wait [#allocation3], 128  }
 0x236   :  { %445 = vsyncadd [#allocation3], 4294967168 }
 0x237   :  { %323 = vsyncpa [#allocation3], 1 }

</bundles_post_ra>
